<compile_context>
chip_gen: v7x
topology: tpu7x:2x2x1
jax: 0.10.0
libtpu: 0.0.40
codegen_flags: <defaults>
</compile_context>

<pallas_src>
import jax
import jax.numpy as jnp
from jax import lax
from jax.experimental import pallas as pl
from jax.experimental.pallas import tpu as pltpu


def attn_matching_kernel(v_ref, embt_ref, o_ref):
    # v_ref:    [n_tile, D]      f32 -- Linear(T->1)-folded self_attn rows
    # embt_ref: [D, l_tile]      f32 -- candidate embeddings, pre-transposed ([K, N] MXU layout)
    # o_ref:    [n_tile, l_tile] f32 -- lane-dense output block
    o_ref[...] = jnp.dot(
        v_ref[...], embt_ref[...], preferred_element_type=jnp.float32
    ).astype(o_ref.dtype)


def _round_up(x: int, m: int) -> int:
    return ((x + m - 1) // m) * m


def _choose_tiling(dim: int, unit: int, max_tile: int, min_tiles: int):
    """Pick a tile size (multiple of `unit`, <= max_tile) and a padded extent that the
    tile divides exactly.  When the dim allows it, produce >= min_tiles tiles (megacore)."""
    assert max_tile % unit == 0
    dim_u = _round_up(dim, unit)
    if dim_u <= unit:
        return unit, unit                         # cannot split below one (sublane/lane) unit
    n_tiles = max(min_tiles, -(-dim_u // max_tile))     # ceil-div
    tile = _round_up(-(-dim_u // n_tiles), unit)        # <= max_tile by construction
    padded = _round_up(dim_u, tile)
    return tile, padded


def attn_matching(self_attn, mat2, traj, emb_table, value_w, loc_max,
                  *, max_l_tile=2048, max_n_tile=512):
    """JAX/Pallas equivalent of AttnMatching.forward (mat2/traj only supply shapes)."""
    N, M, T = traj.shape
    L, _tmp = mat2.shape
    assert L == int(loc_max), "view(N, L) requires L == loc_max"
    D = emb_table.shape[1]
    assert self_attn.shape == (N, T, D)
    assert value_w.shape == (1, T)
    assert emb_table.shape[0] >= L + 1, "embedding table must cover ids 1..loc_max"

    # ---- grid-invariant prep, hoisted out of the Pallas grid (runs exactly once) ----
    # Fold Linear(T->1, bias=False) into self_attn: v[n,d] = sum_t w[t] * sa[n,t,d].
    # f32 end-to-end (D is tiny, so keeping f32 into the MXU costs nothing and restores
    # parity with the f32 PyTorch module).
    v = jnp.einsum("t,ntd->nd",
                   value_w[0].astype(jnp.float32),
                   self_attn.astype(jnp.float32))                       # [N, D] f32

    # Candidate ids are always 1..loc_max -> batch-invariant static slice of the table,
    # pre-transposed once to [D, L] so the kernel RHS is native [K, N] (no per-tile
    # XLU transpose inside the kernel).
    emb_t = lax.slice_in_dim(emb_table, 1, L + 1, axis=0).astype(jnp.float32).T  # [D, L]

    # ---- tiling / padding: lane-dense output, >=2 parallel L-tiles when possible ----
    l_tile, L_pad = _choose_tiling(L, unit=128, max_tile=max_l_tile, min_tiles=2)
    n_tile, N_pad = _choose_tiling(N, unit=8, max_tile=max_n_tile, min_tiles=1)

    if N_pad != N:
        v = jnp.pad(v, ((0, N_pad - N), (0, 0)))                # zero rows -> zero output rows
    if L_pad != L:
        emb_t = jnp.pad(emb_t, ((0, 0), (0, L_pad - L)))        # zero cols -> zero output cols

    grid = (N_pad // n_tile, L_pad // l_tile)

    # Explicit VMEM budget: double-buffered (v tile, emb tile, out tile), all f32,
    # with headroom; capped so it stays inside v7x's 64 MiB physical VMEM.
    resident_bytes = 2 * (n_tile * D + D * l_tile + n_tile * l_tile) * 4
    vmem_limit = min(max(2 * resident_bytes, 16 << 20), 64 << 20)

    cost = pl.CostEstimate(
        flops=2 * N_pad * L_pad * D,
        transcendentals=0,
        bytes_accessed=N_pad * D * 4 + D * L_pad * 4 + N_pad * L_pad * 4,
    )

    out = pl.pallas_call(
        attn_matching_kernel,
        out_shape=jax.ShapeDtypeStruct((N_pad, L_pad), jnp.float32),
        grid=grid,
        in_specs=[
            pl.BlockSpec((n_tile, D), lambda i, j: (i, 0)),      # v: batch-row tiles
            pl.BlockSpec((D, l_tile), lambda i, j: (0, j)),      # emb^T: candidate-column tiles
        ],
        out_specs=pl.BlockSpec((n_tile, l_tile), lambda i, j: (i, j)),
        compiler_params=pltpu.CompilerParams(
            dimension_semantics=("parallel", "parallel"),        # both axes megacore-shardable
            vmem_limit_bytes=vmem_limit,
        ),
        cost_estimate=cost,
    )(v, emb_t)

    # NOTE: at tiny N/L (like the demo shapes) the op is launch/DMA-latency dominated;
    # a production dispatcher could fall back to a plain einsum below a shape threshold.
    # Kept unconditional here so the Pallas path is exercised.
    return out[:N, :L]


def reference(self_attn, mat2, traj, emb_table, value_w, loc_max):
    N, M, T = traj.shape
    L, _ = mat2.shape
    candidates = jnp.arange(1, int(loc_max) + 1, dtype=jnp.int32)
    emb_cand = jnp.broadcast_to(emb_table[candidates], (N, L, emb_table.shape[1]))
    attn = jnp.einsum("nld,ntd->nlt", emb_cand, self_attn)            # [N, L, T]
    return jnp.einsum("nlt,t->nl", attn, value_w[0])                  # [N, L]


if __name__ == "__main__":
    # Small, TPU-friendly shapes consistent with the module's forward.
    N = 2            # batch
    M = 4            # traj middle dim (shape only)
    T = 8            # max_len (self_attn sequence length / Linear in-features)
    D = 32           # embedding dim
    LOC_MAX = 128    # number of candidate locations; L == LOC_MAX
    TMP = 16         # mat2 feature dim (shape only)

    key = jax.random.PRNGKey(0)
    k_emb, k_attn, k_val, k_mat2, k_traj = jax.random.split(key, 5)

    # Deterministic "parameters": embedding table (loc_max + 1 rows, index 0 unused)
    # and nn.Linear(max_len, 1, bias=False) weight of shape [1, max_len].
    emb_table = jax.random.normal(k_emb, (LOC_MAX + 1, D), dtype=jnp.float32) * 0.1
    value_w = jax.random.normal(k_val, (1, T), dtype=jnp.float32) * (1.0 / T)

    # Inputs.
    self_attn = jax.random.normal(k_attn, (N, T, D), dtype=jnp.float32)
    mat2 = jax.random.normal(k_mat2, (LOC_MAX, TMP), dtype=jnp.float32)
    traj = jax.random.randint(k_traj, (N, M, T), 1, LOC_MAX + 1, dtype=jnp.int32)

    out = attn_matching(self_attn, mat2, traj, emb_table, value_w, LOC_MAX)
    out = jax.block_until_ready(out)

    ref = jax.block_until_ready(reference(self_attn, mat2, traj, emb_table, value_w, LOC_MAX))
    assert out.shape == (N, LOC_MAX), out.shape
    # f32 operands with f32 accumulation; only the summation order differs from the
    # reference (Linear folded first), so the tolerance is tight.
    assert jnp.allclose(out, ref, rtol=5e-3, atol=5e-3), float(jnp.max(jnp.abs(out - ref)))

    print("KERNEL_OK")
</pallas_src>

<mosaic_0001>
module attributes {stable_mosaic.version = 11 : i64} {
  func.func @attn_matching_kernel(%arg0: i32, %arg1: i32, %arg2: memref<8x32xf32, #tpu.memory_space<vmem>>, %arg3: memref<32x128xf32, #tpu.memory_space<vmem>>, %arg4: memref<8x128xf32, #tpu.memory_space<vmem>>) attributes {dimension_semantics = [#tpu.dimension_semantics<parallel>, #tpu.dimension_semantics<parallel>], iteration_bounds = array<i64: 1, 1>, scalar_prefetch = 0 : i64, scratch_operands = 0 : i64, tpu.core_type = #tpu.core_type<tc>, window_params = [{transform_indices = @transform_0, window_bounds = array<i64: 8, 32>}, {transform_indices = @transform_1, window_bounds = array<i64: 32, 128>}, {transform_indices = @transform_2, window_bounds = array<i64: 8, 128>}]} {
    %c0 = arith.constant 0 : index
    %c0_0 = arith.constant 0 : index
    %0 = vector.load %arg2[%c0, %c0_0] : memref<8x32xf32, #tpu.memory_space<vmem>>, vector<8x32xf32>
    %c0_1 = arith.constant 0 : index
    %c0_2 = arith.constant 0 : index
    %1 = vector.load %arg3[%c0_1, %c0_2] : memref<32x128xf32, #tpu.memory_space<vmem>>, vector<32x128xf32>
    %cst = arith.constant dense<0.000000e+00> : vector<8x128xf32>
    %2 = tpu.matmul %0, %1, %cst {dimension_numbers = #tpu.dot_dimension_numbers<[1], [0], [0], [1], [0, 0, 1, 1], [], []>} : vector<8x32xf32>, vector<32x128xf32>, vector<8x128xf32> -> vector<8x128xf32>
    %c0_3 = arith.constant 0 : index
    %c0_4 = arith.constant 0 : index
    %3 = vector.load %arg4[%c0_3, %c0_4] : memref<8x128xf32, #tpu.memory_space<vmem>>, vector<8x128xf32>
    tpu.vector_store %arg4[%c0_3, %c0_4], %2 {strides = array<i32>} : memref<8x128xf32, #tpu.memory_space<vmem>>, vector<8x128xf32>,
    return
  }
  func.func @transform_0(%arg0: i32, %arg1: i32) -> (i32, i32) {
    %c0_i32 = arith.constant 0 : i32
    %c0_i32_0 = arith.constant 0 : i32
    return %arg0, %c0_i32 : i32, i32
  }
  func.func @transform_1(%arg0: i32, %arg1: i32) -> (i32, i32) {
    %c0_i32 = arith.constant 0 : i32
    %c0_i32_0 = arith.constant 0 : i32
    return %c0_i32, %arg1 : i32, i32
  }
  func.func @transform_2(%arg0: i32, %arg1: i32) -> (i32, i32) {
    %c0_i32 = arith.constant 0 : i32
    return %arg0, %arg1 : i32, i32
  }
}

</mosaic_0001>

<bundles_post_ra>
// kernel: tpu_custom_call.1
= control target key start
LH: loop header
LB: loop body
LE: loop exit
PB: predicated region body
PF: predicated region fallthrough
CT: control target
= control target key end

     0   :  { %7 = vsyncpa [#allocation3], 0  ;;  %s303_s0 = inlined_call_operand.hbm [shape: f32[8,32], index: 0, kind: input, shape index: {}]   ;;  %s304_s1 = inlined_call_operand.hbm [shape: f32[32,128], index: 1, kind: input, shape index: {}]   ;;  %s305_s2 = inlined_call_operand.hbm [shape: f32[8,128], index: 2, kind: output, shape index: {}]  }
   0x1   :  { %8 = vsyncpa [#allocation6], 0 }
   0x2   :  { %9 = vsyncpa [#allocation4], 0  ;;  %s237_s9 = smov [#allocation2]   ;;  %s238_s11 = smov [#allocation5]  }
   0x3   :  { %s16_s10 = sshll.u32 %s237_s9, 4  ;;  %s25_s12 = sshll.u32 %s238_s11, 4  ;;  %s17_s10 = int_to_ptr.vmem [resolvable:$true] %s16_s10  ;;  %s260_s12 = int_to_ptr.vmem [resolvable:$true] %s25_s12 }
   0x4   :  { %s165_s15 = scalar_lea.hbm %s303_s0, 128 }
   0x5   :  { %p166_p0 = scmp.ne.s32.totalorder %s303_s0, %s165_s15  ;;  %p169_p1 = scmp.lt.u32.totalorder %s165_s15, %s303_s0 }
   0x7   :  { %p171_p2 = pnand %p169_p1, %p166_p0 }
   0x9   :  { %174 = shalt.err (!%p171_p2)
}
   0xa   :  { %s175_s20 = scalar_lea.vmem %s17_s10, 128  ;;  %p180_p4 = scmp.lt.s32.totalorder %s17_s10, %s17_s10 }
   0xb   :  { %p176_p3 = scmp.ne.s32.totalorder %s17_s10, %s175_s20  ;;  %p181_p5 = scmp.lt.s32.totalorder %s175_s20, %s175_s20 }
   0xd   :  { %p182_p6 = por %p181_p5, %p180_p4 }
   0xf   :  { %p183_p7 = pnand %p182_p6, %p176_p3 }
  0x11   :  { %186 = shalt.err (!%p183_p7)
}
  0x12   :  { %19 = dma.hbm_to_vmem [thread:$0]  %s303_s0, 128, %s17_s10, [#allocation3]  }
  0x13   :  { %s187_s25 = scalar_lea.hbm %s304_s1, 512 }
  0x14   :  { %p188_p8 = scmp.ne.s32.totalorder %s304_s1, %s187_s25  ;;  %p191_p9 = scmp.lt.u32.totalorder %s187_s25, %s304_s1 }
  0x16   :  { %p193_p10 = pnand %p191_p9, %p188_p8 }
  0x18   :  { %196 = shalt.err (!%p193_p10)
}
  0x19   :  { %s197_s30 = scalar_lea.vmem %s260_s12, 512  ;;  %p202_p12 = scmp.lt.s32.totalorder %s260_s12, %s260_s12 }
  0x1a   :  { %p198_p11 = scmp.ne.s32.totalorder %s260_s12, %s197_s30  ;;  %p203_p13 = scmp.lt.s32.totalorder %s197_s30, %s197_s30 }
  0x1c   :  { %p204_p0 = por %p203_p13, %p202_p12 }
  0x1e   :  { %p205_p1 = pnand %p204_p0, %p198_p11 }
  0x20   :  { %208 = shalt.err (!%p205_p1)
}
  0x21   :  { %s239_s0 = smov 128   ;;  %s240_s3 = smov 8  }
  0x22   :  { %31 = dma.hbm_to_vmem [thread:$0]  %s304_s1, 512, %s260_s12, [#allocation6], %s239_s0, %s239_s0, %s240_s3  }
  0x23   :  { %231 = dma.done.wait [#allocation3], 128  }
  0x24   :  { %232 = vsyncadd [#allocation3], 4294967168 }
  0x25   :  { %233 = dma.done.wait [#allocation6], 512  }
  0x26   :  { %234 = vsyncadd [#allocation6], 4294966784  ;;  %v241_v0 = vmov 0.0|0.0   ;;  %vm242_vm0 = vmmov 0   ;;  %v243_v1 = vmov 0.0   ;;  %v39_v2 = vld [vmem:[#allocation5] sm:$0xff] }
  0x27   :  { %151 = vmatprep.subr.bf16.mxu0 %v241_v0  ;;  %148 = vmatprep.mubr.msk.f32.mxu0 %vm242_vm0, %v243_v1  ;;  %v40_v3 = vld [vmem:[#allocation5 + $0x8] sm:$0xff]  ;;  %v41_v4 = vld [vmem:[#allocation5 + $0x10] sm:$0xff]  ;;  %v42_v6 = vld [vmem:[#allocation5 + $0x18] sm:$0xff]  ;;  %vm43_vm1 = vcmask 261120   ;;  %s244_s1 = smov [#allocation7]  }
  0x28   :  { %v152_v5 = vpack.c.bf16 %v40_v3, %v39_v2  ;;  %v155_v7 = vpack.c.bf16 %v42_v6, %v41_v4  ;;  %v38_v8 = vld [vmem:[#allocation2] sm:$0xff]  ;;  %s124_s6 = sshll.u32 %s244_s1, 4  ;;  %s125_s6 = int_to_ptr.vmem [resolvable:$true] %s124_s6 }
  0x29   :  { %s209_s7 = scalar_lea.vmem %s125_s6, 128  ;;  %p214_p3 = scmp.lt.s32.totalorder %s125_s6, %s125_s6 }
  0x2a   :  { %153 = vmatpush3.bf16.msra.mxu0 %v152_v5  ;;  %p210_p2 = scmp.ne.s32.totalorder %s125_s6, %s209_s7  ;;  %p215_p4 = scmp.lt.s32.totalorder %s209_s7, %s209_s7 }
  0x2b   :  { %154 = vmatprep.subr.bf16.mxu0 %v241_v0 }
  0x2c   :  { %p216_p5 = por %p215_p4, %p214_p3 }
  0x2e   :  { %156 = vmatpush3.bf16.msra.mxu0 %v155_v7  ;;  %p217_p6 = pnand %p216_p5, %p210_p2 }
  0x31   :  { %149 = vmatmul.mubr.msk.f32.vlgmr.msra.gmra.mrb[0].mxu0 %vm43_vm1, %v38_v8 }
 0x104   :  { %v113_v9 = vpop.f32.mrb[0].mxu0 }
 0x105   :  { %117 = vst [vmem:[#allocation7] sm:$0xff] %v113_v9  ;;  %v150_v10 = vpop.f32.mrb[1].mxu0 }
 0x106   :  { %220 = shalt.err (!%p217_p6)
}
 0x107   :  { %s221_s10 = scalar_lea.hbm %s305_s2, 128 }
 0x108   :  { %p222_p7 = scmp.ne.s32.totalorder %s305_s2, %s221_s10  ;;  %p225_p8 = scmp.lt.u32.totalorder %s221_s10, %s305_s2 }
 0x10a   :  { %p227_p9 = pnand %p225_p8, %p222_p7 }
 0x10c   :  { %230 = shalt.err (!%p227_p9)
}
 0x10d   :  { %127 = dma.vmem_to_hbm [thread:$0]  %s125_s6, 128, %s305_s2, [#allocation4]  }
 0x10e   :  { %235 = dma.done.wait [#allocation4], 128  }
 0x10f   :  { %236 = vsyncadd [#allocation4], 4294967168 }
 0x110   :  { %131 = vsyncpa [#allocation3], 1 }
 0x111   :  { %132 = vsyncpa [#allocation6], 1 }
 0x112   :  { %133 = vsyncpa [#allocation4], 1 }

</bundles_post_ra>
